<compile_context>
chip_gen: v7x
topology: tpu7x:2x2x1
jax: 0.10.0
libtpu: 0.0.40
codegen_flags: <defaults>
</compile_context>

<pallas_src>
import functools

import jax
import jax.numpy as jnp
from jax.experimental import pallas as pl
from jax.experimental.pallas import tpu as pltpu

_JOINTS = 20                  # joints per sample (fixed by reshape(-1, 20, 3))
_COORDS = 3                   # xyz
_ROW = _JOINTS * _COORDS      # 60 values per sample
_LANES = 1920                 # lcm(3, 128) * 5 -> 15 vregs wide, % 3 == 0


def _round_up(x, m):
    return (x + m - 1) // m * m


def _euclid_partial_kernel(p_ref, g_ref, o_ref, *, m_rows, tile_rows):
    """One grid step: partial sum of per-joint Euclidean distances.

    p_ref / g_ref : (tile_rows, 1920) tiles in native dtype (upcast in-register).
    o_ref         : (8, 128) f32 slab; partial sum at [0, 0], zeros elsewhere.
    """
    i = pl.program_id(0)
    last = pl.num_programs(0) - 1

    # Native-dtype DMA already happened; upcast in-register (VPU).
    d = p_ref[...].astype(jnp.float32) - g_ref[...].astype(jnp.float32)   # (R, 1920)
    sq = d * d

    # xyz grouping on the XLU (idle unit): ssq[l] = sq[l-1] + sq[l] + sq[l+1]
    # (circular within the row).  Joint j's sum lands on its middle lane
    # l = 3j + 1.  Lanes 0 and LANES-1 (the only wrap-affected lanes) are never
    # valid joint lanes, so the circular wrap is harmless.  Shifts {1, W-1}
    # make the result independent of the roll direction convention.
    lanes = sq.shape[-1]
    ssq = sq + pltpu.roll(sq, shift=1, axis=1) + pltpu.roll(sq, shift=lanes - 1, axis=1)
    dist = jnp.sqrt(ssq)                                                  # EUP

    # Joint-lane mask (l % 3 == 1), built as a tiny (1, LANES) strip.  The
    # float floor-divide is exact for all lane indices < 2**23.
    lane_i = jax.lax.broadcasted_iota(jnp.int32, (1, lanes), 1)
    third = jnp.floor(lane_i.astype(jnp.float32) * (1.0 / 3.0)).astype(jnp.int32)
    lane_ok = (lane_i - 3 * third) == 1                                   # (1, LANES)

    def write(partial):
        # Lane-/sublane-aligned (8, 128) output slab (satisfies the (8, 128)
        # tiling rule); wrapper just sums the whole output array.
        r = jax.lax.broadcasted_iota(jnp.int32, (8, 128), 0)
        c = jax.lax.broadcasted_iota(jnp.int32, (8, 128), 1)
        o_ref[...] = jnp.where((r == 0) & (c == 0), partial, 0.0)

    @pl.when(i != last)
    def _():
        write(jnp.sum(jnp.where(lane_ok, dist, 0.0)))

    @pl.when(i == last)
    def _():
        # Only the last tile can be ragged: discard rows past the true row
        # count (Pallas pads the final block with garbage that may be
        # non-finite; the element-wise select cannot propagate it).
        rows_left = m_rows - i * tile_rows
        row = jax.lax.broadcasted_iota(jnp.int32, dist.shape, 0)
        ok = lane_ok & (row < rows_left)
        write(jnp.sum(jnp.where(ok, dist, 0.0)))


def euclidian_distance(prediction, ground_truth, *, block_rows=512):
    """Exact equivalent of EuclidianDistance.forward (returns a scalar)."""
    if prediction.size != ground_truth.size:
        raise ValueError("prediction / ground_truth size mismatch")
    total = int(prediction.size)
    if total == 0 or total % _ROW != 0:
        raise ValueError(f"element count must be a positive multiple of {_ROW}")
    n_samples = total // _ROW
    n_joints = n_samples * _JOINTS

    # Flat, layout-preserving views (free reshapes, no transpose / cast).
    p = jnp.ravel(prediction)
    g = jnp.ravel(ground_truth)

    # Lane-dense packing: view as (M, 1920).  Free whenever 1920 | total
    # (N % 32 == 0); otherwise zero-pad once - padded joints have distance 0
    # and we divide by the *true* joint count below.
    pad = (-total) % _LANES
    if pad:
        p = jnp.pad(p, (0, pad))
        g = jnp.pad(g, (0, pad))
    m_rows = (total + pad) // _LANES
    p2 = p.reshape(m_rows, _LANES)
    g2 = g.reshape(m_rows, _LANES)

    # Row-tile size: whole array if it fits in one block (block == full dims is
    # always legal), otherwise a dtype-aware multiple-of-{8,16,32} tile with an
    # in-kernel tail mask on the last grid step only.
    min_itemsize = max(1, min(p2.dtype.itemsize, g2.dtype.itemsize))
    mult = max(8, 32 // min_itemsize)
    tn = _round_up(max(int(block_rows), 1), mult)
    if m_rows <= tn:
        tn = m_rows
    num_blocks = pl.cdiv(m_rows, tn)

    bytes_in = total * (p2.dtype.itemsize + g2.dtype.itemsize)
    cost = pl.CostEstimate(
        flops=8 * m_rows * _LANES,              # sub + square + roll-adds + sums
        transcendentals=m_rows * _LANES,        # sqrt over the full lane width
        bytes_accessed=bytes_in + num_blocks * 8 * 128 * 4,
    )

    partials = pl.pallas_call(
        functools.partial(_euclid_partial_kernel, m_rows=m_rows, tile_rows=tn),
        out_shape=jax.ShapeDtypeStruct((num_blocks * 8, 128), jnp.float32),
        grid_spec=pltpu.PrefetchScalarGridSpec(
            num_scalar_prefetch=0,
            grid=(num_blocks,),
            in_specs=[
                pl.BlockSpec((tn, _LANES), lambda i: (i, 0)),
                pl.BlockSpec((tn, _LANES), lambda i: (i, 0)),
            ],
            out_specs=pl.BlockSpec((8, 128), lambda i: (i, 0)),
        ),
        compiler_params=pltpu.CompilerParams(
            dimension_semantics=("parallel",),      # independent partial sums
            vmem_limit_bytes=48 * 1024 * 1024,      # headroom under v7x 64 MiB
        ),
        cost_estimate=cost,
    )(p2, g2)

    # Tiny final reduction in plain JAX; divide once by the true joint count.
    # (Partial-per-tile sums already give a two-level f32 reduction.)
    return jnp.sum(partials) / jnp.float32(n_joints)


if __name__ == "__main__":
    def reference(pr, gt):
        p3 = pr.reshape(-1, _JOINTS, _COORDS).astype(jnp.float32)
        g3 = gt.reshape(-1, _JOINTS, _COORDS).astype(jnp.float32)
        return jnp.mean(jnp.mean(jnp.sqrt(jnp.sum((p3 - g3) ** 2, axis=-1)), axis=-1))

    key = jax.random.PRNGKey(0)
    checks = [
        # (samples, dtype, block_rows, tol)
        (8,   jnp.float32,  512, 1e-5),   # unaligned N -> zero-pad path, single block
        (50,  jnp.bfloat16, 512, 1e-4),   # unaligned N, bf16 in-register upcast
        (320, jnp.float32,  8,   1e-5),   # aligned (N%32==0), multi-block + ragged tail
        (544, jnp.bfloat16, 16,  1e-4),   # aligned, bf16, multi-block + ragged tail
    ]
    for idx, (n, dtype, br, tol) in enumerate(checks):
        key, k1, k2 = jax.random.split(key, 3)
        pred = jax.random.normal(k1, (n, _ROW), dtype=jnp.float32).astype(dtype)
        gtru = jax.random.normal(k2, (n, _ROW), dtype=jnp.float32).astype(dtype)
        out = jax.block_until_ready(euclidian_distance(pred, gtru, block_rows=br))
        ref = reference(pred, gtru)
        assert jnp.allclose(out, ref, rtol=tol, atol=tol), (idx, out, ref)

    print("KERNEL_OK")
</pallas_src>

<mosaic_0001>
module attributes {stable_mosaic.version = 11 : i64} {
  func.func @_euclid_partial_kernel(%arg0: i32, %arg1: memref<1x1920xf32, #tpu.memory_space<vmem>>, %arg2: memref<1x1920xf32, #tpu.memory_space<vmem>>, %arg3: memref<8x128xf32, #tpu.memory_space<vmem>>) attributes {dimension_semantics = [#tpu.dimension_semantics<parallel>], iteration_bounds = array<i64: 1>, scalar_prefetch = 0 : i64, scratch_operands = 0 : i64, tpu.core_type = #tpu.core_type<tc>, window_params = [{transform_indices = @transform_0, window_bounds = array<i64: 1, 1920>}, {transform_indices = @transform_1, window_bounds = array<i64: 1, 1920>}, {transform_indices = @transform_2, window_bounds = array<i64: 8, 128>}]} {
    %c0 = arith.constant 0 : index
    %c0_0 = arith.constant 0 : index
    %0 = vector.load %arg1[%c0, %c0_0] : memref<1x1920xf32, #tpu.memory_space<vmem>>, vector<1x1920xf32>
    %c0_1 = arith.constant 0 : index
    %c0_2 = arith.constant 0 : index
    %1 = vector.load %arg2[%c0_1, %c0_2] : memref<1x1920xf32, #tpu.memory_space<vmem>>, vector<1x1920xf32>
    %2 = arith.subf %0, %1 : vector<1x1920xf32>
    %3 = arith.mulf %2, %2 : vector<1x1920xf32>
    %c1_i32 = arith.constant 1 : i32
    %4 = tpu.dynamic_rotate %3 by %c1_i32 dim 1 : vector<1x1920xf32>, i32 -> vector<1x1920xf32>
    %5 = arith.addf %3, %4 : vector<1x1920xf32>
    %c1919_i32 = arith.constant 1919 : i32
    %6 = tpu.dynamic_rotate %3 by %c1919_i32 dim 1 : vector<1x1920xf32>, i32 -> vector<1x1920xf32>
    %7 = arith.addf %5, %6 : vector<1x1920xf32>
    %8 = math.sqrt %7 : vector<1x1920xf32>
    %9 = tpu.iota {dimensions = array<i32: 1>} : vector<1x1920xi32>
    %10 = arith.sitofp %9 : vector<1x1920xi32> to vector<1x1920xf32>
    %cst = arith.constant 0.333333343 : f32
    %11 = vector.broadcast %cst : f32 to vector<1x1920xf32>
    %12 = arith.mulf %10, %11 : vector<1x1920xf32>
    %13 = math.floor %12 : vector<1x1920xf32>
    %14 = arith.fptosi %13 : vector<1x1920xf32> to vector<1x1920xi32>
    %c3_i32 = arith.constant 3 : i32
    %15 = vector.broadcast %c3_i32 : i32 to vector<1x1920xi32>
    %16 = arith.muli %15, %14 : vector<1x1920xi32>
    %17 = arith.subi %9, %16 : vector<1x1920xi32>
    %c1_i32_3 = arith.constant 1 : i32
    %18 = vector.broadcast %c1_i32_3 : i32 to vector<1x1920xi32>
    %19 = arith.cmpi eq, %17, %18 : vector<1x1920xi32>
    %c0_i32 = arith.constant 0 : i32
    %20 = arith.cmpi ne, %arg0, %c0_i32 : i32
    %21 = arith.extui %20 : i1 to i32
    %c0_i32_4 = arith.constant 0 : i32
    %22 = arith.cmpi ne, %21, %c0_i32_4 : i32
    scf.if %22 {
      %cst_7 = arith.constant 0.000000e+00 : f32
      %26 = vector.broadcast %cst_7 : f32 to vector<1x1920xf32>
      %27 = arith.select %19, %8, %26 : vector<1x1920xi1>, vector<1x1920xf32>
      %28 = vector.shape_cast %27 : vector<1x1920xf32> to vector<1x1x1920xf32>
      %cst_8 = arith.constant dense<0.000000e+00> : vector<1xf32>
      %29 = vector.multi_reduction <add>, %28, %cst_8 [1, 2] : vector<1x1x1920xf32> to vector<1xf32>
      %30 = vector.shape_cast %29 : vector<1xf32> to vector<1x1x1xf32>
      %31 = vector.extract %30[0, 0, 0] : f32 from vector<1x1x1xf32>
      %32 = tpu.iota {dimensions = array<i32: 0>} : vector<8x128xi32>
      %33 = tpu.iota {dimensions = array<i32: 1>} : vector<8x128xi32>
      %c0_i32_9 = arith.constant 0 : i32
      %34 = vector.broadcast %c0_i32_9 : i32 to vector<8x128xi32>
      %35 = arith.cmpi eq, %32, %34 : vector<8x128xi32>
      %c0_i32_10 = arith.constant 0 : i32
      %36 = vector.broadcast %c0_i32_10 : i32 to vector<8x128xi32>
      %37 = arith.cmpi eq, %33, %36 : vector<8x128xi32>
      %38 = arith.andi %35, %37 : vector<8x128xi1>
      %cst_11 = arith.constant 0.000000e+00 : f32
      %39 = vector.broadcast %31 : f32 to vector<8x128xf32>
      %40 = vector.broadcast %cst_11 : f32 to vector<8x128xf32>
      %41 = arith.select %38, %39, %40 : vector<8x128xi1>, vector<8x128xf32>
      %c0_12 = arith.constant 0 : index
      %c0_13 = arith.constant 0 : index
      %42 = vector.load %arg3[%c0_12, %c0_13] : memref<8x128xf32, #tpu.memory_space<vmem>>, vector<8x128xf32>
      tpu.vector_store %arg3[%c0_12, %c0_13], %41 {strides = array<i32>} : memref<8x128xf32, #tpu.memory_space<vmem>>, vector<8x128xf32>,
    } else {
    }
    %c0_i32_5 = arith.constant 0 : i32
    %23 = arith.cmpi eq, %arg0, %c0_i32_5 : i32
    %24 = arith.extui %23 : i1 to i32
    %c0_i32_6 = arith.constant 0 : i32
    %25 = arith.cmpi ne, %24, %c0_i32_6 : i32
    scf.if %25 {
      %c1_i32_7 = arith.constant 1 : i32
      %26 = arith.muli %arg0, %c1_i32_7 : i32
      %c1_i32_8 = arith.constant 1 : i32
      %27 = arith.subi %c1_i32_8, %26 : i32
      %28 = tpu.iota {dimensions = array<i32: 0>} : vector<1x1920xi32>
      %29 = vector.broadcast %27 : i32 to vector<1x1920xi32>
      %30 = arith.cmpi slt, %28, %29 : vector<1x1920xi32>
      %31 = arith.andi %19, %30 : vector<1x1920xi1>
      %cst_9 = arith.constant 0.000000e+00 : f32
      %32 = vector.broadcast %cst_9 : f32 to vector<1x1920xf32>
      %33 = arith.select %31, %8, %32 : vector<1x1920xi1>, vector<1x1920xf32>
      %34 = vector.shape_cast %33 : vector<1x1920xf32> to vector<1x1x1920xf32>
      %cst_10 = arith.constant dense<0.000000e+00> : vector<1xf32>
      %35 = vector.multi_reduction <add>, %34, %cst_10 [1, 2] : vector<1x1x1920xf32> to vector<1xf32>
      %36 = vector.shape_cast %35 : vector<1xf32> to vector<1x1x1xf32>
      %37 = vector.extract %36[0, 0, 0] : f32 from vector<1x1x1xf32>
      %38 = tpu.iota {dimensions = array<i32: 0>} : vector<8x128xi32>
      %39 = tpu.iota {dimensions = array<i32: 1>} : vector<8x128xi32>
      %c0_i32_11 = arith.constant 0 : i32
      %40 = vector.broadcast %c0_i32_11 : i32 to vector<8x128xi32>
      %41 = arith.cmpi eq, %38, %40 : vector<8x128xi32>
      %c0_i32_12 = arith.constant 0 : i32
      %42 = vector.broadcast %c0_i32_12 : i32 to vector<8x128xi32>
      %43 = arith.cmpi eq, %39, %42 : vector<8x128xi32>
      %44 = arith.andi %41, %43 : vector<8x128xi1>
      %cst_13 = arith.constant 0.000000e+00 : f32
      %45 = vector.broadcast %37 : f32 to vector<8x128xf32>
      %46 = vector.broadcast %cst_13 : f32 to vector<8x128xf32>
      %47 = arith.select %44, %45, %46 : vector<8x128xi1>, vector<8x128xf32>
      %c0_14 = arith.constant 0 : index
      %c0_15 = arith.constant 0 : index
      %48 = vector.load %arg3[%c0_14, %c0_15] : memref<8x128xf32, #tpu.memory_space<vmem>>, vector<8x128xf32>
      tpu.vector_store %arg3[%c0_14, %c0_15], %47 {strides = array<i32>} : memref<8x128xf32, #tpu.memory_space<vmem>>, vector<8x128xf32>,
    } else {
    }
    return
  }
  func.func @transform_0(%arg0: i32) -> (i32, i32) {
    %c0_i32 = arith.constant 0 : i32
    %c0_i32_0 = arith.constant 0 : i32
    return %arg0, %c0_i32 : i32, i32
  }
  func.func @transform_1(%arg0: i32) -> (i32, i32) {
    %c0_i32 = arith.constant 0 : i32
    %c0_i32_0 = arith.constant 0 : i32
    return %arg0, %c0_i32 : i32, i32
  }
  func.func @transform_2(%arg0: i32) -> (i32, i32) {
    %c0_i32 = arith.constant 0 : i32
    %c0_i32_0 = arith.constant 0 : i32
    return %arg0, %c0_i32 : i32, i32
  }
}

</mosaic_0001>

<bundles_post_ra>
// kernel: tpu_custom_call.1
= control target key start
LH: loop header
LB: loop body
LE: loop exit
PB: predicated region body
PF: predicated region fallthrough
CT: control target
= control target key end

     0   :  { %7 = vsyncpa [#allocation3], 0  ;;  %s1476_s0 = inlined_call_operand.hbm [shape: f32[1,1920], index: 0, kind: input, shape index: {}]   ;;  %s1477_s1 = inlined_call_operand.hbm [shape: f32[1,1920], index: 1, kind: input, shape index: {}]   ;;  %s1478_s2 = inlined_call_operand.hbm [shape: f32[8,128], index: 2, kind: output, shape index: {}]  }
   0x1   :  { %8 = vsyncpa [#allocation6], 0 }
   0x2   :  { %9 = vsyncpa [#allocation4], 0  ;;  %s1014_s9 = smov [#allocation2]   ;;  %s1015_s11 = smov [#allocation5]  }
   0x3   :  { %s16_s10 = sshll.u32 %s1014_s9, 4  ;;  %s26_s12 = sshll.u32 %s1015_s11, 4  ;;  %s17_s10 = int_to_ptr.vmem [resolvable:$true] %s16_s10  ;;  %s27_s12 = int_to_ptr.vmem [resolvable:$true] %s26_s12 }
   0x4   :  { %s942_s15 = scalar_lea.hbm %s1476_s0, 240 }
   0x5   :  { %p943_p0 = scmp.ne.s32.totalorder %s1476_s0, %s942_s15  ;;  %p946_p1 = scmp.lt.u32.totalorder %s942_s15, %s1476_s0 }
   0x7   :  { %p948_p2 = pnand %p946_p1, %p943_p0 }
   0x9   :  { %951 = shalt.err (!%p948_p2)
}
   0xa   :  { %s952_s20 = scalar_lea.vmem %s17_s10, 240  ;;  %s956_s21 = scalar_lea.vmem %s17_s10, 256 }
   0xb   :  { %p953_p3 = scmp.ne.s32.totalorder %s17_s10, %s952_s20  ;;  %p957_p4 = scmp.lt.s32.totalorder %s17_s10, %s17_s10 }
   0xc   :  { %p958_p5 = scmp.lt.s32.totalorder %s956_s21, %s952_s20 }
   0xe   :  { %p959_p6 = por %p958_p5, %p957_p4 }
  0x10   :  { %p960_p7 = pnand %p959_p6, %p953_p3 }
  0x12   :  { %963 = shalt.err (!%p960_p7)
}
  0x13   :  { %19 = dma.hbm_to_vmem [thread:$0]  %s1476_s0, 240, %s17_s10, [#allocation3]  }
  0x14   :  { %s964_s26 = scalar_lea.hbm %s1477_s1, 240 }
  0x15   :  { %p965_p8 = scmp.ne.s32.totalorder %s1477_s1, %s964_s26  ;;  %p968_p9 = scmp.lt.u32.totalorder %s964_s26, %s1477_s1 }
  0x17   :  { %p970_p10 = pnand %p968_p9, %p965_p8 }
  0x19   :  { %973 = shalt.err (!%p970_p10)
}
  0x1a   :  { %s974_s3 = scalar_lea.vmem %s27_s12, 240  ;;  %s978_s4 = scalar_lea.vmem %s27_s12, 256 }
  0x1b   :  { %p975_p11 = scmp.ne.s32.totalorder %s27_s12, %s974_s3  ;;  %p979_p12 = scmp.lt.s32.totalorder %s27_s12, %s27_s12 }
  0x1c   :  { %p980_p13 = scmp.lt.s32.totalorder %s978_s4, %s974_s3 }
  0x1e   :  { %p981_p0 = por %p980_p13, %p979_p12 }
  0x20   :  { %p982_p1 = pnand %p981_p0, %p975_p11 }
  0x22   :  { %985 = shalt.err (!%p982_p1)
}
  0x23   :  { %29 = dma.hbm_to_vmem [thread:$0]  %s1477_s1, 240, %s27_s12, [#allocation6]  }
  0x24   :  { %1008 = dma.done.wait [#allocation3], 240  }
  0x25   :  { %1009 = vsyncadd [#allocation3], 4294967056 }
  0x26   :  { %1010 = dma.done.wait [#allocation6], 240  }
  0x27   :  { %1011 = vsyncadd [#allocation6], 4294967056  ;;  %v46_v0 = vlaneseq  ;;  %v36_v2 = vld [vmem:[#allocation2] sm:$0xff]  ;;  %v38_v3 = vld [vmem:[#allocation5] sm:$0xff]  ;;  %s1016_s1 = smov 1   ;;  %s1017_s6 = smov 127  }
  0x28   :  { %v40_v4 = vsub.f32 %v36_v2, %v38_v3  ;;  %v37_v16 = vld [vmem:[#allocation2 + $0x8] sm:$0xff]  ;;  %v39_v17 = vld [vmem:[#allocation5 + $0x8] sm:$0xff]  ;;  %v1018_v39 = vmov 1966171168   ;;  %vm839_vm7 = vcmask 1040384   ;;  %s1019_s7 = smov [#allocation7]  }
  0x29   :  { %v1060_v1 = vshrl.u32 %v46_v0, 7  ;;  %v41_v22 = vsub.f32 %v37_v16, %v39_v17  ;;  %v189_v40 = vunpack.c.l.s4 %v1018_v39  ;;  %v1137_v43 = vand.u32 127, %v46_v0  ;;  %s890_s8 = sshll.u32 %s1019_s7, 4  ;;  %s891_s8 = int_to_ptr.vmem [resolvable:$true] %s890_s8 }
  0x2a   :  { %v1068_v7 = vmul.f32 %v40_v4, %v40_v4  ;;  %s986_s10 = scalar_lea.vmem %s891_s8, 128  ;;  %p991_p3 = scmp.lt.s32.totalorder %s891_s8, %s891_s8 }
  0x2b   :  { %v1063_v5 = vsub.s32 2, %v1060_v1  ;;  %v1066_v6 = vsub.s32 0, %v1060_v1  ;;  %v1071_v8 = vsub.s32 3, %v1060_v1  ;;  %v1074_v9 = vsub.s32 1, %v1060_v1  ;;  %p987_p2 = scmp.ne.s32.totalorder %s891_s8, %s986_s10  ;;  %p992_p4 = scmp.lt.s32.totalorder %s986_s10, %s986_s10 }
  0x2c   :  { %v1087_v14 = vsub.s32 5, %v1060_v1  ;;  %v1090_v15 = vsub.s32 4, %v1060_v1  ;;  %v76_v18 = vsub.s32 7, %v1060_v1  ;;  %v1100_v21 = vsub.s32 6, %v1060_v1 }
  0x2d   :  { %v57_v10 = vrot.slane %v1068_v7, %v1063_v5  ;;  %v49_v11 = vrot.slane %v1068_v7, %v1066_v6  ;;  %v61_v12 = vrot.slane %v1068_v7, %v1071_v8  ;;  %v53_v13 = vrot.slane %v1068_v7, %v1074_v9  ;;  %p993_p5 = por %p992_p4, %p991_p3 }
  0x2e   :  { %v69_v19 = vrot.slane %v1068_v7, %v1087_v14  ;;  %v65_v20 = vrot.slane %v1068_v7, %v1090_v15  ;;  %v77_v23 = vrot.slane %v1068_v7, %v76_v18  ;;  %v73_v24 = vrot.slane %v1068_v7, %v1100_v21 }
  0x2f   :  { %125 = vrot.lane.b32.xlu1 %v57_v10, %s1016_s1  ;;  %121 = vrot.lane.b32.xlu0 %v49_v11, %s1016_s1  ;;  %v1109_v25 = vmul.f32 %v41_v22, %v41_v22  ;;  %v190_v44 = vunpack.c.0.s8 %v189_v40  ;;  %v1140_v45 = vadd.s32 128, %v1137_v43  ;;  %v1143_v46 = vadd.s32 256, %v1137_v43  ;;  %p994_p6 = pnand %p993_p5, %p987_p2 }
  0x30   :  { %v1150_v49 = vadd.s32 384, %v1137_v43  ;;  %v1153_v50 = vadd.s32 512, %v1137_v43  ;;  %v1156_v51 = vadd.s32 640, %v1137_v43  ;;  %vm153_vm0 = vcmp.lt.s32.totalorder %v1137_v43, 1 }
  0x31   :  { %v105_v26 = vrot.slane %v1109_v25, %v1100_v21  ;;  %v81_v27 = vrot.slane %v1109_v25, %v1066_v6  ;;  %v85_v28 = vrot.slane %v1109_v25, %v1074_v9  ;;  %v93_v29 = vrot.slane %v1109_v25, %v1071_v8 }
  0x32   :  { %v89_v30 = vrot.slane %v1109_v25, %v1063_v5  ;;  %v101_v31 = vrot.slane %v1109_v25, %v1087_v14  ;;  %v97_v32 = vrot.slane %v1109_v25, %v1090_v15  ;;  %v1160_v52 = vsub.s32 %v190_v44, %v1060_v1 }
  0x33   :  { %127 = vrot.lane.b32.xlu1 %v61_v12, %s1016_s1  ;;  %123 = vrot.lane.b32.xlu0 %v53_v13, %s1016_s1  ;;  %v1163_v53 = vadd.s32 768, %v1137_v43  ;;  %v1166_v54 = vadd.s32 896, %v1137_v43  ;;  %v475_v56 = vcvt.s32.f32 %v1137_v43  ;;  %v476_v57 = vcvt.s32.f32 %v1140_v45 }
  0x34   :  { %v477_v58 = vcvt.s32.f32 %v1143_v46  ;;  %v478_v62 = vcvt.s32.f32 %v1150_v49  ;;  %v479_v63 = vcvt.s32.f32 %v1153_v50  ;;  %v480_v0 = vcvt.s32.f32 %v1156_v51 }
  0x35   :  { %vm315_vm1 = vcmp.lt.s32.totalorder %v1137_v43, 127  ;;  %vm731_vm5 = vcmp.lt.s32.totalorder %v1060_v1, 1 }
  0x37   :  { %131 = vrot.lane.b32.xlu1 %v69_v19, %s1016_s1  ;;  %129 = vrot.lane.b32.xlu0 %v65_v20, %s1016_s1 }
  0x3b   :  { %135 = vrot.lane.b32.xlu1 %v77_v23, %s1016_s1  ;;  %133 = vrot.lane.b32.xlu0 %v73_v24, %s1016_s1 }
  0x3f   :  { %285 = vrot.lane.b32.xlu1 %v49_v11, %s1017_s6  ;;  %149 = vrot.lane.b32.xlu0 %v105_v26, %s1016_s1 }
  0x43   :  { %289 = vrot.lane.b32.xlu1 %v57_v10, %s1017_s6  ;;  %287 = vrot.lane.b32.xlu0 %v53_v13, %s1017_s6  ;;  %v482_v13 = vcvt.s32.f32 %v1166_v54 }
  0x47   :  { %293 = vrot.lane.b32.xlu1 %v65_v20, %s1017_s6  ;;  %291 = vrot.lane.b32.xlu0 %v61_v12, %s1017_s6  ;;  %v481_v12 = vcvt.s32.f32 %v1163_v53  ;;  %v491_v20 = vmul.f32 0.33333334, %v476_v57 }
  0x49   :  { %v506_v40 = vfloor.f32 %v491_v20 }
  0x4b   :  { %297 = vrot.lane.b32.xlu1 %v73_v24, %s1017_s6  ;;  %295 = vrot.lane.b32.xlu0 %v69_v19, %s1017_s6  ;;  %v490_v19 = vmul.f32 0.33333334, %v475_v56 }
  0x4d   :  { %v505_v39 = vfloor.f32 %v490_v19 }
  0x4f   :  { %301 = vrot.lane.b32.xlu1 %v81_v27, %s1017_s6  ;;  %299 = vrot.lane.b32.xlu0 %v77_v23, %s1017_s6 }
  0x53   :  { %139 = vrot.lane.b32.xlu1 %v85_v28, %s1016_s1  ;;  %137 = vrot.lane.b32.xlu0 %v81_v27, %s1016_s1  ;;  %v492_v27 = vmul.f32 0.33333334, %v477_v58 }
  0x55   :  { %v507_v58 = vfloor.f32 %v492_v27 }
  0x57   :  { %143 = vrot.lane.b32.xlu1 %v93_v29, %s1016_s1  ;;  %141 = vrot.lane.b32.xlu0 %v89_v30, %s1016_s1 }
  0x5b   :  { %147 = vrot.lane.b32.xlu1 %v101_v31, %s1016_s1  ;;  %145 = vrot.lane.b32.xlu0 %v97_v32, %s1016_s1 }
  0x5f   :  { %305 = vrot.lane.b32.xlu1 %v89_v30, %s1017_s6  ;;  %303 = vrot.lane.b32.xlu0 %v85_v28, %s1017_s6  ;;  %v493_v28 = vmul.f32 0.33333334, %v478_v62 }
  0x61   :  { %v508_v62 = vfloor.f32 %v493_v28 }
  0x63   :  { %309 = vrot.lane.b32.xlu1 %v97_v32, %s1017_s6  ;;  %307 = vrot.lane.b32.xlu0 %v93_v29, %s1017_s6  ;;  %v495_v32 = vmul.f32 0.33333334, %v480_v0 }
  0x67   :  { %313 = vrot.lane.b32.xlu1 %v105_v26, %s1017_s6  ;;  %311 = vrot.lane.b32.xlu0 %v101_v31, %s1017_s6  ;;  %v494_v31 = vmul.f32 0.33333334, %v479_v63 }
  0x69   :  { %v509_v63 = vfloor.f32 %v494_v31 }
  0x6b   :  { %v908_v27 = vtrunc.f32 %v509_v63 }
  0xa1   :  { %v126_v33 = vpop.permute.xlu1 %125  ;;  %v122_v34 = vpop.permute.xlu0 %121 }
  0xa5   :  { %v128_v35 = vpop.permute.xlu1 %127  ;;  %v124_v36 = vpop.permute.xlu0 %123 }
  0xa6   :  { %v165_v59 = vsel %vm153_vm0, %v126_v33, %v128_v35  ;;  %v166_v2 = vsel %vm153_vm0, %v124_v36, %v126_v33  ;;  %v167_v3 = vsel %vm153_vm0, %v122_v34, %v124_v36  ;;  %v497_v36 = vmul.f32 0.33333334, %v482_v13 }
  0xa7   :  { %v185_v22 = vcombine.low %v166_v2, %v165_v59 }
  0xa9   :  { %v132_v37 = vpop.permute.xlu1 %131  ;;  %v130_v38 = vpop.permute.xlu0 %129 }
  0xaa   :  { %v163_v16 = vsel %vm153_vm0, %v130_v38, %v132_v37  ;;  %v164_v17 = vsel %vm153_vm0, %v128_v35, %v130_v38  ;;  %v496_v35 = vmul.f32 0.33333334, %v481_v12  ;;  %v902_v12 = vtrunc.f32 %v506_v40 }
  0xab   :  { %v186_v33 = vcombine.low %v164_v17, %v163_v16 }
  0xad   :  { %v1134_v41 = vpop.permute.xlu1 %135  ;;  %v134_v42 = vpop.permute.xlu0 %133 }
  0xae   :  { %v161_v4 = vsel %vm153_vm0, %v134_v42, %v1134_v41  ;;  %v162_v10 = vsel %vm153_vm0, %v132_v37, %v134_v42  ;;  %v201_v42 = vrot.slane %v185_v22, %v1160_v52  ;;  %v904_v22 = vtrunc.f32 %v507_v58 }
  0xaf   :  { %v187_v23 = vcombine.low %v162_v10, %v161_v4  ;;  %v511_v4 = vfloor.f32 %v496_v35  ;;  %v512_v10 = vfloor.f32 %v497_v36  ;;  %v909_v58 = vcvt.f32.s32 %v908_v27 }
  0xb0   :  { %v1237_v27 = vadd.s32 1024, %v1137_v43 }
  0xb1   :  { %v1145_v47 = vpop.permute.xlu1 %285  ;;  %v1147_v48 = vpop.permute.xlu0 %149  ;;  %v215_v44 = vrot.slane %v187_v23, %v1160_v52  ;;  %v914_v35 = vtrunc.f32 %v512_v10 }
  0xb2   :  { %v168_v55 = vsel %vm153_vm0, %v1147_v48, %v122_v34 }
  0xb3   :  { %v184_v11 = vcombine.low %v168_v55, %v167_v3  ;;  %v510_v3 = vfloor.f32 %v495_v32 }
  0xb5   :  { %v290_v60 = vpop.permute.xlu1 %289  ;;  %v288_v61 = vpop.permute.xlu0 %287  ;;  %v194_v34 = vrot.slane %v184_v11, %v1160_v52  ;;  %v900_v11 = vtrunc.f32 %v505_v39  ;;  %v910_v31 = vtrunc.f32 %v510_v3 }
  0xb6   :  { %v328_v37 = vsel %vm315_vm1, %v288_v61, %v290_v60  ;;  %v329_v38 = vsel %vm315_vm1, %v1145_v47, %v288_v61  ;;  %v208_v61 = vrot.slane %v186_v33, %v1160_v52  ;;  %v903_v33 = vcvt.f32.s32 %v902_v12 }
  0xb7   :  { %v216_v0 = vcombine.low %v194_v34, %v201_v42  ;;  %v346_v2 = vcombine.low %v329_v38, %v328_v37  ;;  %v901_v32 = vcvt.f32.s32 %v900_v11  ;;  %v912_v34 = vtrunc.f32 %v511_v4 }
  0xb8   :  { %v217_v13 = vcombine.low %v208_v61, %v215_v44  ;;  %v905_v44 = vcvt.f32.s32 %v904_v22  ;;  %v915_v4 = vcvt.f32.s32 %v914_v35 }
  0xb9   :  { %v294_v24 = vpop.permute.xlu1 %293  ;;  %v292_v26 = vpop.permute.xlu0 %291  ;;  %v224_v28 = vrot.slane %v216_v0, %v1160_v52  ;;  %v913_v3 = vcvt.f32.s32 %v912_v34 }
  0xba   :  { %v326_v29 = vsel %vm315_vm1, %v292_v26, %v294_v24  ;;  %v327_v30 = vsel %vm315_vm1, %v290_v60, %v292_v26  ;;  %v906_v26 = vtrunc.f32 %v508_v62  ;;  %v231_v36 = vrot.slane %v217_v13, %v1160_v52 }
  0xbb   :  { %v347_v55 = vcombine.low %v327_v30, %v326_v29  ;;  %v356_v29 = vrot.slane %v346_v2, %v1160_v52  ;;  %v536_v62 = vmul.u32 3, %v903_v33  ;;  %v537_v10 = vmul.u32 3, %v905_v44 }
  0xbd   :  { %v298_v56 = vpop.permute.xlu1 %297  ;;  %v296_v57 = vpop.permute.xlu0 %295  ;;  %v363_v16 = vrot.slane %v347_v55, %v1160_v52  ;;  %v232_v55 = vcombine.low %v224_v28, %v231_v36  ;;  %v551_v22 = vsub.s32 %v1140_v45, %v536_v62  ;;  %v1239_v28 = vmul.u32 3, %v913_v3 }
  0xbe   :  { %v324_v59 = vsel %vm315_vm1, %v296_v57, %v298_v56  ;;  %v325_v60 = vsel %vm315_vm1, %v294_v24, %v296_v57  ;;  %v907_v57 = vcvt.f32.s32 %v906_v26 }
  0xbf   :  { %v348_v17 = vcombine.low %v325_v60, %v324_v59  ;;  %v378_v37 = vcombine.low %v356_v29, %v363_v16  ;;  %v911_v59 = vcvt.f32.s32 %v910_v31  ;;  %v535_v60 = vmul.u32 3, %v901_v32 }
  0xc0   :  { %v283_v11 = vadd.f32 %v232_v55, %v1068_v7  ;;  %v538_v13 = vmul.u32 3, %v907_v57  ;;  %v1228_v16 = vmul.u32 3, %v909_v58  ;;  %v552_v32 = vsub.s32 %v1143_v46, %v537_v10 }
  0xc1   :  { %v1213_v19 = vpop.permute.xlu1 %301  ;;  %v300_v20 = vpop.permute.xlu0 %299  ;;  %v370_v38 = vrot.slane %v348_v17, %v1160_v52  ;;  %v386_v63 = vrot.slane %v378_v37, %v1160_v52  ;;  %v1230_v17 = vmul.u32 3, %v911_v59  ;;  %v1241_v7 = vmul.u32 3, %v915_v4 }
  0xc2   :  { %v322_v23 = vsel %vm315_vm1, %v300_v20, %v1213_v19  ;;  %v323_v24 = vsel %vm315_vm1, %v298_v56, %v300_v20  ;;  %v550_v20 = vsub.s32 %v1137_v43, %v535_v60  ;;  %v553_v33 = vsub.s32 %v1150_v49, %v538_v13 }
  0xc3   :  { %v349_v30 = vcombine.low %v323_v24, %v322_v23  ;;  %v554_v34 = vsub.s32 %v1153_v50, %v1228_v16  ;;  %v1264_v46 = vadd.s32 1152, %v1137_v43  ;;  %v1267_v49 = vadd.s32 1280, %v1137_v43 }
  0xc4   :  { %vm1269_vm2 = vcmp.eq.s32.totalorder %v550_v20, 1  ;;  %vm1279_vm3 = vcmp.eq.s32.totalorder %v551_v22, 1  ;;  %v1287_v59 = vadd.s32 1536, %v1137_v43  ;;  %v1290_v60 = vadd.s32 1664, %v1137_v43 }
  0xc5   :  { %v377_v39 = vrot.slane %v349_v30, %v1160_v52  ;;  %v140_v40 = vpop.permute.xlu1 %139  ;;  %v138_v42 = vpop.permute.xlu0 %137  ;;  %vm1301_vm4 = vcmp.eq.s32.totalorder %v552_v32, 1  ;;  %v484_v10 = vcvt.s32.f32 %v1264_v46  ;;  %vm1316_vm6 = vcmp.eq.s32.totalorder %v553_v33, 1  ;;  %vm1346_vm11 = vmand %vm1269_vm2, %vm731_vm5 }
  0xc6   :  { %v159_v35 = vsel %vm153_vm0, %v138_v42, %v140_v40  ;;  %v160_v36 = vsel %vm153_vm0, %v1134_v41, %v138_v42  ;;  %v483_v41 = vcvt.s32.f32 %v1237_v27  ;;  %v556_v42 = vsub.s32 %v1163_v53, %v1239_v28  ;;  %vm733_vm12 = vmand %vm1279_vm3, %vm731_vm5 }
  0xc7   :  { %v379_v56 = vcombine.low %v370_v38, %v377_v39  ;;  %v555_v38 = vsub.s32 %v1156_v51, %v1230_v17  ;;  %v233_v57 = vcombine.low %v160_v36, %v159_v35  ;;  %vm1335_vm9 = vcmp.eq.s32.totalorder %v554_v34, 1  ;;  %vm734_vm13 = vmand %vm1301_vm4, %vm731_vm5 }
  0xc8   :  { %v498_v16 = vmul.f32 0.33333334, %v483_v41  ;;  %vm735_vm14 = vmand %vm1316_vm6, %vm731_vm5  ;;  %vm571_vm2 = vcmp.eq.s32.totalorder %v556_v42, 1 }
  0xc9   :  { %v393_v61 = vrot.slane %v379_v56, %v1160_v52  ;;  %v144_v0 = vpop.permute.xlu1 %143  ;;  %v142_v2 = vpop.permute.xlu0 %141  ;;  %v242_v20 = vrot.slane %v233_v57, %v1160_v52  ;;  %vm736_vm15 = vmand %vm1335_vm9, %vm731_vm5 }
  0xca   :  { %v157_v29 = vsel %vm153_vm0, %v142_v2, %v144_v0  ;;  %v158_v30 = vsel %vm153_vm0, %v140_v40, %v142_v2  ;;  %v1274_v40 = vadd.s32 1408, %v1137_v43  ;;  %vm738_vm3 = vmand %vm571_vm2, %vm731_vm5 }
  0xcb   :  { %v394_v12 = vcombine.low %v386_v63, %v393_v61  ;;  %v234_v39 = vcombine.low %v158_v30, %v157_v29 }
  0xcd   :  { %v1234_v23 = vadd.f32 %v394_v12, %v283_v11  ;;  %v148_v24 = vpop.permute.xlu1 %147  ;;  %v146_v26 = vpop.permute.xlu0 %145  ;;  %v249_v2 = vrot.slane %v234_v39, %v1160_v52  ;;  %v485_v11 = vcvt.s32.f32 %v1267_v49 }
  0xce   :  { %v155_v45 = vsel %vm153_vm0, %v146_v26, %v148_v24  ;;  %v156_v31 = vsel %vm153_vm0, %v144_v0, %v146_v26  ;;  %v154_v58 = vsel %vm153_vm0, %v148_v24, %v1147_v48  ;;  %v1299_v0 = vadd.s32 1792, %v1137_v43 }
  0xcf   :  { %938 = vrsqrt.f32 %v1234_v23  ;;  %v235_v37 = vcombine.low %v156_v31, %v155_v45  ;;  %v263_v12 = vrot.slane %v154_v58, %v1160_v52  ;;  %v486_v26 = vcvt.s32.f32 %v1274_v40 }
  0xd0   :  { %v487_v45 = vcvt.s32.f32 %v1287_v59  ;;  %v488_v31 = vcvt.s32.f32 %v1290_v60  ;;  %v489_v32 = vcvt.s32.f32 %v1299_v0  ;;  %v264_v36 = vcombine.low %v242_v20, %v249_v2 }
  0xd1   :  { %v306_v44 = vpop.permute.xlu1 %305  ;;  %v304_v55 = vpop.permute.xlu0 %303  ;;  %v256_v62 = vrot.slane %v235_v37, %v1160_v52  ;;  %v500_v41 = vmul.f32 0.33333334, %v485_v11  ;;  %vm449_vm8 = vcmp.eq.f32.partialorder %v1234_v23, inf  ;;  %vm451_vm10 = vcmp.eq.f32.partialorder %v1234_v23, 0.0 }
  0xd2   :  { %v320_v63 = vsel %vm315_vm1, %v304_v55, %v306_v44  ;;  %v321_v61 = vsel %vm315_vm1, %v1213_v19, %v304_v55  ;;  %v499_v55 = vmul.f32 0.33333334, %v484_v10  ;;  %v272_v34 = vrot.slane %v264_v36, %v1160_v52 }
  0xd3   :  { %v395_v22 = vcombine.low %v321_v61, %v320_v63  ;;  %v265_v30 = vcombine.low %v256_v62, %v263_v12  ;;  %v513_v62 = vfloor.f32 %v498_v16  ;;  %v452_v63 = vand.u32 2147483648, %v1234_v23 }
  0xd4   :  { %vm570_vm0 = vcmp.eq.s32.totalorder %v555_v38, 1 }
  0xd5   :  { %v310_v3 = vpop.permute.xlu1 %309  ;;  %v308_v4 = vpop.permute.xlu0 %307  ;;  %v404_v61 = vrot.slane %v395_v22, %v1160_v52  ;;  %v501_v22 = vmul.f32 0.33333334, %v486_v26 }
  0xd6   :  { %v318_v19 = vsel %vm315_vm1, %v308_v4, %v310_v3  ;;  %v319_v13 = vsel %vm315_vm1, %v306_v44, %v308_v4 }
  0xd7   :  { %v396_v24 = vcombine.low %v319_v13, %v318_v19 }
  0xd9   :  { %v939_v35 = vpop.eup %938  ;;  %v411_v37 = vrot.slane %v396_v24, %v1160_v52  ;;  %v314_v39 = vpop.permute.xlu1 %313  ;;  %v502_v24 = vmul.f32 0.33333334, %v487_v45 }
  0xda   :  { %v312_v44 = vpop.permute.xlu0 %311  ;;  %v448_v33 = vmul.f32 %v939_v35, %v1234_v23  ;;  %v330_v57 = vsel %vm315_vm1, %v314_v39, %v1145_v47  ;;  %v279_v47 = vrot.slane %v265_v30, %v1160_v52  ;;  %v514_v30 = vfloor.f32 %v499_v55 }
  0xdb   :  { %v316_v58 = vsel %vm315_vm1, %v312_v44, %v314_v39  ;;  %v317_v2 = vsel %vm315_vm1, %v310_v3, %v312_v44  ;;  %v426_v19 = vcombine.low %v404_v61, %v411_v37  ;;  %v425_v13 = vrot.slane %v330_v57, %v1160_v52  ;;  %vm737_vm1 = vmand %vm570_vm0, %vm731_vm5 }
  0xdc   :  { %v450_v10 = vsel %vm449_vm8, %v1234_v23, %v448_v33  ;;  %v397_v11 = vcombine.low %v317_v2, %v316_v58  ;;  %v515_v35 = vfloor.f32 %v500_v41  ;;  %v280_v56 = vcombine.low %v272_v34, %v279_v47 }
  0xdd   :  { %v1350_v3 = vsel %vm451_vm10, %v452_v63, %v450_v10  ;;  %v503_v44 = vmul.f32 0.33333334, %v488_v31  ;;  %v504_v33 = vmul.f32 0.33333334, %v489_v32  ;;  %v916_v57 = vtrunc.f32 %v513_v62 }
  0xde   :  { %v418_v23 = vrot.slane %v397_v11, %v1160_v52  ;;  %v752_v50 = vrot.slane %v1350_v3, %v1066_v6  ;;  %v756_v16 = vrot.slane %v1350_v3, %v1074_v9  ;;  %v760_v20 = vrot.slane %v1350_v3, %v1063_v5 }
  0xdf   :  { %v764_v26 = vrot.slane %v1350_v3, %v1071_v8  ;;  %v434_v45 = vrot.slane %v426_v19, %v1160_v52  ;;  %v516_v58 = vfloor.f32 %v501_v22  ;;  %v517_v63 = vfloor.f32 %v502_v24 }
  0xe0   :  { %v427_v36 = vcombine.low %v418_v23, %v425_v13  ;;  %v824_v37 = vsel %vm1346_vm11, %v752_v50, 0.0  ;;  %v825_v39 = vsel %vm733_vm12, %v756_v16, 0.0  ;;  %v826_v48 = vsel %vm734_vm13, %v760_v20, 0.0 }
  0xe1   :  { %v840_v41 = vsel %vm839_vm7, %v824_v37, 0.0  ;;  %v918_v31 = vtrunc.f32 %v514_v30  ;;  %v841_v32 = vsel %vm839_vm7, %v825_v39, 0.0  ;;  %v284_v62 = vadd.f32 %v280_v56, %v1109_v25 }
  0xe2   :  { %v441_v55 = vrot.slane %v427_v36, %v1160_v52  ;;  %v920_v2 = vtrunc.f32 %v515_v35  ;;  %v842_v10 = vadd.f32 %v841_v32, %v840_v41  ;;  %v518_v47 = vfloor.f32 %v503_v44 }
  0xe3   :  { %v768_v52 = vrot.slane %v1350_v3, %v1090_v15  ;;  %v827_v11 = vsel %vm735_vm14, %v764_v26, 0.0  ;;  %v843_v29 = vsel %vm839_vm7, %v826_v48, 0.0  ;;  %v519_v34 = vfloor.f32 %v504_v33 }
  0xe4   :  { %v442_v61 = vcombine.low %v434_v45, %v441_v55  ;;  %v917_v19 = vcvt.f32.s32 %v916_v57  ;;  %v844_v13 = vadd.f32 %v843_v29, %v842_v10  ;;  %v919_v25 = vcvt.f32.s32 %v918_v31 }
  0xe5   :  { %v922_v23 = vtrunc.f32 %v516_v58  ;;  %v924_v50 = vtrunc.f32 %v517_v63  ;;  %v921_v16 = vcvt.f32.s32 %v920_v2  ;;  %v845_v20 = vsel %vm839_vm7, %v827_v11, 0.0 }
  0xe6   :  { %v446_v12 = vadd.f32 %v442_v61, %v284_v62  ;;  %v772_v22 = vrot.slane %v1350_v3, %v1087_v14  ;;  %v828_v24 = vsel %vm736_vm15, %v768_v52, 0.0  ;;  %v846_v30 = vadd.f32 %v845_v20, %v844_v13 }
  0xe7   :  { %v926_v35 = vtrunc.f32 %v518_v47  ;;  %v928_v4 = vtrunc.f32 %v519_v34  ;;  %v543_v56 = vmul.u32 3, %v917_v19  ;;  %v557_v36 = vsub.s32 %v1166_v54, %v1241_v7 }
  0xe8   :  { %940 = vrsqrt.f32 %v446_v12  ;;  %v923_v51 = vcvt.f32.s32 %v922_v23  ;;  %v925_v17 = vcvt.f32.s32 %v924_v50  ;;  %v544_v38 = vmul.u32 3, %v919_v25 }
  0xe9   :  { %v545_v37 = vmul.u32 3, %v921_v16  ;;  %v847_v39 = vsel %vm839_vm7, %v828_v24, 0.0  ;;  %v776_v44 = vrot.slane %v1350_v3, %v1100_v21  ;;  %v829_v33 = vsel %vm737_vm1, %v772_v22, 0.0 }
  0xea   :  { %v848_v57 = vadd.f32 %v847_v39, %v846_v30  ;;  %v927_v26 = vcvt.f32.s32 %v926_v35  ;;  %v929_v54 = vcvt.f32.s32 %v928_v4  ;;  %v558_v7 = vsub.s32 %v1237_v27, %v543_v56 }
  0xeb   :  { %v546_v45 = vmul.u32 3, %v923_v51  ;;  %v547_v55 = vmul.u32 3, %v925_v17  ;;  %v559_v53 = vsub.s32 %v1264_v46, %v544_v38  ;;  %vm572_vm4 = vcmp.eq.s32.totalorder %v557_v36, 1 }
  0xec   :  { %v560_v28 = vsub.s32 %v1267_v49, %v545_v37  ;;  %v849_v42 = vsel %vm839_vm7, %v829_v33, 0.0  ;;  %v780_v48 = vrot.slane %v1350_v3, %v76_v18  ;;  %v830_v41 = vsel %vm738_vm3, %v776_v44, 0.0  ;;  %vm1416_vm8 = vmand %vm572_vm4, %vm731_vm5 }
  0xed   :  { %v850_v58 = vadd.f32 %v849_v42, %v848_v57  ;;  %v548_v27 = vmul.u32 3, %v927_v26  ;;  %v549_v31 = vmul.u32 3, %v929_v54  ;;  %vm573_vm6 = vcmp.eq.s32.totalorder %v558_v7, 1 }
  0xee   :  { %v561_v49 = vsub.s32 %v1274_v40, %v546_v45  ;;  %v562_v62 = vsub.s32 %v1287_v59, %v547_v55  ;;  %vm574_vm9 = vcmp.eq.s32.totalorder %v559_v53, 1  ;;  %vm456_vm10 = vcmp.eq.f32.partialorder %v446_v12, inf  ;;  %vm740_vm13 = vmand %vm573_vm6, %vm731_vm5 }
  0xef   :  { %v459_v18 = vand.u32 2147483648, %v446_v12  ;;  %vm1422_vm11 = vcmp.eq.s32.totalorder %v560_v28, 1  ;;  %v851_v61 = vsel %vm839_vm7, %v830_v41, 0.0  ;;  %vm458_vm12 = vcmp.eq.f32.partialorder %v446_v12, 0.0  ;;  %vm741_vm14 = vmand %vm574_vm9, %vm731_vm5 }
  0xf0   :  { %v831_v10 = vsel %vm1416_vm8, %v780_v48, 0.0  ;;  %v852_v40 = vadd.f32 %v851_v61, %v850_v58  ;;  %v563_v59 = vsub.s32 %v1290_v60, %v548_v27  ;;  %vm576_vm15 = vcmp.eq.s32.totalorder %v561_v49, 1  ;;  %vm742_vm1 = vmand %vm1422_vm11, %vm731_vm5 }
  0xf1   :  { %vm577_vm0 = vcmp.eq.s32.totalorder %v562_v62, 1  ;;  %v853_v60 = vsel %vm839_vm7, %v831_v10, 0.0  ;;  %vm743_vm2 = vmand %vm576_vm15, %vm731_vm5 }
  0xf2   :  { %v941_v63 = vpop.eup %940  ;;  %v854_v25 = vadd.f32 %v853_v60, %v852_v40  ;;  %vm578_vm3 = vcmp.eq.s32.totalorder %v563_v59, 1  ;;  %vm744_vm4 = vmand %vm577_vm0, %vm731_vm5 }
  0xf3   :  { %v455_v46 = vmul.f32 %v941_v63, %v446_v12  ;;  %vm745_vm8 = vmand %vm578_vm3, %vm731_vm5 }
  0xf5   :  { %v457_v2 = vsel %vm456_vm10, %v446_v12, %v455_v46  ;;  %v564_v12 = vsub.s32 %v1299_v0, %v549_v31  ;;  %vm879_vm10 = vcmp.eq.s32.totalorder %v1137_v43, 0 }
  0xf6   :  { %v460_v47 = vsel %vm458_vm12, %v459_v18, %v457_v2 }
  0xf7   :  { %v784_v52 = vrot.slane %v460_v47, %v1066_v6  ;;  %v788_v11 = vrot.slane %v460_v47, %v1074_v9  ;;  %v792_v29 = vrot.slane %v460_v47, %v1063_v5  ;;  %v796_v34 = vrot.slane %v460_v47, %v1071_v8 }
  0xf8   :  { %v800_v6 = vrot.slane %v460_v47, %v1090_v15  ;;  %vm579_vm6 = vcmp.eq.s32.totalorder %v564_v12, 1  ;;  %v804_v8 = vrot.slane %v460_v47, %v1087_v14  ;;  %v808_v22 = vrot.slane %v460_v47, %v1100_v21 }
  0xf9   :  { %v832_v19 = vsel %vm740_vm13, %v784_v52, 0.0  ;;  %v833_v13 = vsel %vm741_vm14, %v788_v11, 0.0  ;;  %v834_v9 = vsel %vm742_vm1, %v792_v29, 0.0  ;;  %v835_v50 = vsel %vm743_vm2, %v796_v34, 0.0  ;;  %vm746_vm9 = vmand %vm579_vm6, %vm731_vm5 }
  0xfa   :  { %v855_v5 = vsel %vm839_vm7, %v832_v19, 0.0  ;;  %v857_v23 = vsel %vm839_vm7, %v833_v13, 0.0  ;;  %v859_v20 = vsel %vm839_vm7, %v834_v9, 0.0  ;;  %v836_v15 = vsel %vm744_vm4, %v800_v6, 0.0 }
  0xfb   :  { %v856_v0 = vadd.f32 %v855_v5, %v854_v25  ;;  %v861_v30 = vsel %vm839_vm7, %v835_v50, 0.0  ;;  %v837_v35 = vsel %vm745_vm8, %v804_v8, 0.0  ;;  %v863_v14 = vsel %vm839_vm7, %v836_v15, 0.0 }
  0xfc   :  { %v838_v56 = vsel %vm746_vm9, %v808_v22, 0.0  ;;  %v865_v51 = vsel %vm839_vm7, %v837_v35, 0.0  ;;  %vm878_vm5 = vcmp.eq.s32.totalorder %v1060_v1, 0 }
  0xfd   :  { %v858_v16 = vadd.f32 %v857_v23, %v856_v0  ;;  %v867_v38 = vsel %vm839_vm7, %v838_v56, 0.0  ;;  %vm880_vm11 = vmand %vm878_vm5, %vm879_vm10 }
  0xff   :  { %v860_v24 = vadd.f32 %v859_v20, %v858_v16 }
 0x101   :  { %v862_v4 = vadd.f32 %v861_v30, %v860_v24 }
 0x103   :  { %v864_v36 = vadd.f32 %v863_v14, %v862_v4 }
 0x105   :  { %v866_v17 = vadd.f32 %v865_v51, %v864_v36 }
 0x107   :  { %v868_v37 = vadd.f32 %v867_v38, %v866_v17 }
 0x109   :  { %869 = vadd.xlane.f32.xlu0 %v868_v37 }
 0x196   :  { %v870_v21 = vpop.xlane.xlu0 %869 }
 0x197   :  { %v871_v39 = vrot.slane %v870_v21, 4 }
 0x199   :  { %v872_v44 = vadd.f32 %v871_v39, %v870_v21 }
 0x19b   :  { %v873_v33 = vrot.slane %v872_v44, 2 }
 0x19d   :  { %v874_v57 = vadd.f32 %v873_v33, %v872_v44 }
 0x19f   :  { %v875_v26 = vrot.slane %v874_v57, 1 }
 0x1a1   :  { %v876_v54 = vadd.f32 %v875_v26, %v874_v57 }
 0x1a3   :  { %930 = vpush %v876_v54 }
 0x1d4   :  { %s931_s9 = spop %930 }
 0x1d5   :  { %v881_v7 = vstv %s931_s9 }
 0x1d6   :  { %v882_v45 = vsel %vm880_vm11, %v881_v7, 0.0 }
 0x1d7   :  { %883 = vst [vmem:[#allocation7] sm:$0xff] %v882_v45 }
 0x1d8   :  { %997 = shalt.err (!%p994_p6)
}
 0x1d9   :  { %s998_s13 = scalar_lea.hbm %s1478_s2, 128 }
 0x1da   :  { %p999_p7 = scmp.ne.s32.totalorder %s1478_s2, %s998_s13  ;;  %p1002_p8 = scmp.lt.u32.totalorder %s998_s13, %s1478_s2 }
 0x1dc   :  { %p1004_p9 = pnand %p1002_p8, %p999_p7 }
 0x1de   :  { %1007 = shalt.err (!%p1004_p9)
}
 0x1df   :  { %893 = dma.vmem_to_hbm [thread:$0]  %s891_s8, 128, %s1478_s2, [#allocation4]  }
 0x1e0   :  { %1012 = dma.done.wait [#allocation4], 128  }
 0x1e1   :  { %1013 = vsyncadd [#allocation4], 4294967168 }
 0x1e2   :  { %897 = vsyncpa [#allocation3], 1 }
 0x1e3   :  { %898 = vsyncpa [#allocation6], 1 }
 0x1e4   :  { %899 = vsyncpa [#allocation4], 1 }

</bundles_post_ra>
